<compile_context>
chip_gen: v7x
topology: tpu7x:2x2x1
jax: 0.10.0
libtpu: 0.0.40
codegen_flags: <defaults>
</compile_context>

<pallas_src>
import functools

import jax
import jax.numpy as jnp
from jax.experimental import pallas as pl
from jax.experimental.pallas import tpu as pltpu


def _round_up(x, m):
    return ((x + m - 1) // m) * m


def _vmem_capacity_bytes():
    """Physical VMEM per TensorCore; conservative (v7x) fallback."""
    try:
        return int(pltpu.get_tpu_info().vmem_capacity_bytes)
    except Exception:  # interpret mode / older jax
        return 64 << 20


def _sublane_multiple(dtype):
    # 8 for 32-bit, 16 for bf16/fp16, 32 for 8-bit dtypes.
    return max(8, 32 // jnp.dtype(dtype).itemsize)


def _pick_tile(extent, bytes_per_unit, granule, *, other_steps=1, min_tile=None):
    """Tile size along one axis of a memory-bound kernel.

    Targets ~8 MiB of input per grid step (double-buffered in+out working set
    ~32 MiB), keeps enough total grid steps to overlap the DMA pipeline (and
    feed both v7x TensorCores), and never shrinks below ~2 MiB of input per
    step just to create steps.  Result is a multiple of `granule` unless it
    covers the full extent (which is always a legal block dim).
    """
    vmem = _vmem_capacity_bytes()
    bytes_per_unit = max(1, bytes_per_unit)
    # VMEM cap: 2x input + 2x output buffers (+16 MiB slack) must fit.
    cap_bytes = max(granule * bytes_per_unit, (vmem - (16 << 20)) // 4)
    tile = min(8 << 20, cap_bytes) // bytes_per_unit
    # Pipeline depth: >= 8 total steps on 64 MiB-VMEM chips (v7x, 2 TCs),
    # >= 4 otherwise -- but don't shrink blocks below ~2 MiB to get there.
    min_steps = 8 if vmem <= (64 << 20) else 4
    need = pl.cdiv(min_steps, max(1, other_steps))
    want = _round_up(pl.cdiv(extent, max(1, need)), granule)
    floor = (2 << 20) // bytes_per_unit
    if min_tile is not None:
        floor = max(floor, min_tile)
    floor = max(granule, floor)
    tile = min(tile, max(floor, want))
    tile = max(granule, (tile // granule) * granule)
    if tile >= extent:
        return extent
    return tile


def _vmem_limit_bytes(block_bytes):
    vmem = _vmem_capacity_bytes()
    ws = 4 * block_bytes + (8 << 20)   # double-buffered in+out + params/scratch slack
    return int(min(max(32 << 20, ws), vmem - (16 << 20)))


# --------------------------------------------------------------------------
# Kernels
# --------------------------------------------------------------------------
def _ln_last_kernel(x_ref, w_ref, b_ref, o_ref, *, eps):
    # x_ref: (tm, C); normalize each row over the last (lane) axis.
    x = x_ref[...].astype(jnp.float32)
    mean = jnp.mean(x, axis=-1, keepdims=True)
    xc = x - mean
    var = jnp.mean(xc * xc, axis=-1, keepdims=True)
    inv = jax.lax.rsqrt(var + eps)
    w = w_ref[...].astype(jnp.float32)            # (1, C)
    b = b_ref[...].astype(jnp.float32)            # (1, C)
    o_ref[...] = (xc * inv * w + b).astype(o_ref.dtype)


def _ln_last_packed_kernel(x_ref, w_ref, b_ref, seg_ref, o_ref, *, eps, c):
    # x_ref: (tm, 128) -- each vreg row holds g = 128 // c logical rows.
    # seg_ref: (128, 128) block-diagonal ones matrix; x @ seg computes the
    # per-segment sums broadcast back to every lane of that segment.  The
    # reduction runs on the otherwise-idle MXU and keeps loads/stores
    # lane-dense (no masked partial vst for C < 128).
    x = x_ref[...].astype(jnp.float32)
    seg = seg_ref[...]
    inv_c = 1.0 / float(c)
    mean = jnp.dot(x, seg, preferred_element_type=jnp.float32) * inv_c
    xc = x - mean
    var = jnp.dot(xc * xc, seg, preferred_element_type=jnp.float32) * inv_c
    inv = jax.lax.rsqrt(var + eps)
    o_ref[...] = (xc * inv * w_ref[...] + b_ref[...]).astype(o_ref.dtype)


def _ln_first_kernel(x_ref, w_ref, b_ref, o_ref, *, eps):
    # x_ref: (1, C, thw) NCHW block; normalize over the channel (sublane) axis.
    x = x_ref[...].astype(jnp.float32)
    mean = jnp.mean(x, axis=1, keepdims=True)
    xc = x - mean
    var = jnp.mean(xc * xc, axis=1, keepdims=True)
    inv = jax.lax.rsqrt(var + eps)
    w = w_ref[...].astype(jnp.float32)            # (1, C, 1)
    b = b_ref[...].astype(jnp.float32)            # (1, C, 1)
    o_ref[...] = (xc * inv * w + b).astype(o_ref.dtype)


# --------------------------------------------------------------------------
# channels_last wrappers: (R, C), normalize over C
# --------------------------------------------------------------------------
def _layernorm_channels_last_direct(x2d, weight, bias, eps):
    R, C = x2d.shape
    itemsize = jnp.dtype(x2d.dtype).itemsize
    tm = _pick_tile(R, C * itemsize, _sublane_multiple(x2d.dtype))
    block_bytes = tm * C * itemsize
    cost = pl.CostEstimate(
        flops=int(7 * R * C),
        transcendentals=int(R),
        bytes_accessed=int(2 * R * C * itemsize + 2 * C * 4),
    )
    return pl.pallas_call(
        functools.partial(_ln_last_kernel, eps=eps),
        out_shape=jax.ShapeDtypeStruct((R, C), x2d.dtype),
        grid_spec=pltpu.PrefetchScalarGridSpec(
            num_scalar_prefetch=0,
            grid=(pl.cdiv(R, tm),),
            in_specs=[
                pl.BlockSpec((tm, C), lambda i: (i, 0)),
                pl.BlockSpec((1, C), lambda i: (0, 0)),
                pl.BlockSpec((1, C), lambda i: (0, 0)),
            ],
            out_specs=pl.BlockSpec((tm, C), lambda i: (i, 0)),
        ),
        compiler_params=pltpu.CompilerParams(
            dimension_semantics=("parallel",),
            vmem_limit_bytes=_vmem_limit_bytes(block_bytes),
        ),
        cost_estimate=cost,
    )(x2d, weight.reshape(1, C), bias.reshape(1, C))


def _layernorm_channels_last_packed(x2d, weight, bias, eps):
    R, C = x2d.shape
    g = 128 // C
    Rg = R // g
    itemsize = jnp.dtype(x2d.dtype).itemsize

    xp = x2d.reshape(Rg, 128)                      # free row-major view
    w_t = jnp.tile(weight.astype(jnp.float32).reshape(1, C), (1, g))   # (1, 128)
    b_t = jnp.tile(bias.astype(jnp.float32).reshape(1, C), (1, g))     # (1, 128)
    lane = jnp.arange(128, dtype=jnp.int32) // C
    seg = (lane[:, None] == lane[None, :]).astype(jnp.float32)         # (128, 128)

    tm = _pick_tile(Rg, 128 * itemsize, _sublane_multiple(x2d.dtype))
    block_bytes = tm * 128 * itemsize
    cost = pl.CostEstimate(
        flops=int(7 * R * C + 4 * Rg * 128 * 128),
        transcendentals=int(R),
        bytes_accessed=int(2 * R * C * itemsize + 128 * 128 * 4 + 2 * 128 * 4),
    )
    y = pl.pallas_call(
        functools.partial(_ln_last_packed_kernel, eps=eps, c=C),
        out_shape=jax.ShapeDtypeStruct((Rg, 128), x2d.dtype),
        grid_spec=pltpu.PrefetchScalarGridSpec(
            num_scalar_prefetch=0,
            grid=(pl.cdiv(Rg, tm),),
            in_specs=[
                pl.BlockSpec((tm, 128), lambda i: (i, 0)),
                pl.BlockSpec((1, 128), lambda i: (0, 0)),
                pl.BlockSpec((1, 128), lambda i: (0, 0)),
                pl.BlockSpec((128, 128), lambda i: (0, 0)),
            ],
            out_specs=pl.BlockSpec((tm, 128), lambda i: (i, 0)),
        ),
        compiler_params=pltpu.CompilerParams(
            dimension_semantics=("parallel",),
            vmem_limit_bytes=_vmem_limit_bytes(block_bytes),
        ),
        cost_estimate=cost,
    )(xp, w_t, b_t, seg)
    return y.reshape(R, C)


def _layernorm_channels_last(x2d, weight, bias, eps):
    R, C = x2d.shape
    if 0 < C < 128 and 128 % C == 0 and R % (128 // C) == 0:
        return _layernorm_channels_last_packed(x2d, weight, bias, eps)
    # TODO(synk): for C < 128 with R not divisible by g, a packed main body +
    # small remainder call would keep stores lane-dense without a jnp.pad copy.
    return _layernorm_channels_last_direct(x2d, weight, bias, eps)


# --------------------------------------------------------------------------
# channels_first wrapper: (N, C, H, W), normalize over C, fused NCHW layout
# --------------------------------------------------------------------------
def _layernorm_channels_first(x, weight, bias, eps):
    N, C, H, W = x.shape
    HW = H * W
    x3 = x.reshape(N, C, HW)                       # free contiguous view
    itemsize = jnp.dtype(x.dtype).itemsize

    # Lane tile; keep each of the C contiguous strided-DMA chunks >= ~2 KiB.
    thw = _pick_tile(HW, C * itemsize, 128,
                     other_steps=N,
                     min_tile=max(128, 2048 // itemsize))
    block_bytes = C * thw * itemsize
    cost = pl.CostEstimate(
        flops=int(7 * N * C * HW),
        transcendentals=int(N * HW),
        bytes_accessed=int(2 * N * C * HW * itemsize + 2 * C * 4),
    )
    # TODO(synk): for HW < 128 with large C, routing via a single NCHW->NHWC
    # transpose into the lane-dense channels_last kernel could beat the
    # masked-lane stores of this path.
    y = pl.pallas_call(
        functools.partial(_ln_first_kernel, eps=eps),
        out_shape=jax.ShapeDtypeStruct((N, C, HW), x.dtype),
        grid_spec=pltpu.PrefetchScalarGridSpec(
            num_scalar_prefetch=0,
            grid=(N, pl.cdiv(HW, thw)),
            in_specs=[
                pl.BlockSpec((1, C, thw), lambda n, j: (n, 0, j)),
                pl.BlockSpec((1, C, 1), lambda n, j: (0, 0, 0)),
                pl.BlockSpec((1, C, 1), lambda n, j: (0, 0, 0)),
            ],
            out_specs=pl.BlockSpec((1, C, thw), lambda n, j: (n, 0, j)),
        ),
        compiler_params=pltpu.CompilerParams(
            dimension_semantics=("parallel", "parallel"),
            vmem_limit_bytes=_vmem_limit_bytes(block_bytes),
        ),
        cost_estimate=cost,
    )(x3, weight.reshape(1, C, 1), bias.reshape(1, C, 1))
    return y.reshape(N, C, H, W)


# --------------------------------------------------------------------------
# Module wrapper
# --------------------------------------------------------------------------
class LayerNorm:
    """JAX/Pallas equivalent of the PyTorch LayerNorm module."""

    def __init__(self, normalized_shape, eps=1e-6, data_format="channels_last"):
        if data_format not in ("channels_last", "channels_first"):
            raise NotImplementedError
        self.eps = float(eps)
        self.data_format = data_format
        self.normalized_shape = (normalized_shape,)
        # deterministic parameter init (matches nn.Parameter(ones/zeros))
        self.weight = jnp.ones((normalized_shape,), dtype=jnp.float32)
        self.bias = jnp.zeros((normalized_shape,), dtype=jnp.float32)

    def __call__(self, x):
        C = self.normalized_shape[0]
        if self.data_format == "channels_last":
            assert x.shape[-1] == C
            lead = x.shape[:-1]
            x2d = x.reshape(-1, C)
            y2d = _layernorm_channels_last(x2d, self.weight, self.bias, self.eps)
            return y2d.reshape(*lead, C)
        else:  # channels_first: x is (N, C, H, W), normalize over axis 1
            assert x.shape[1] == C
            return _layernorm_channels_first(x, self.weight, self.bias, self.eps)


# --------------------------------------------------------------------------
# References & test
# --------------------------------------------------------------------------
def _ref_channels_first(x, w, b, eps):
    u = jnp.mean(x, axis=1, keepdims=True)
    s = jnp.mean((x - u) ** 2, axis=1, keepdims=True)
    xn = (x - u) / jnp.sqrt(s + eps)
    return w[None, :, None, None] * xn + b[None, :, None, None]


def _ref_channels_last(x, w, b, eps):
    u = jnp.mean(x, axis=-1, keepdims=True)
    s = jnp.mean((x - u) ** 2, axis=-1, keepdims=True)
    xn = (x - u) / jnp.sqrt(s + eps)
    return xn * w + b


if __name__ == "__main__":
    key = jax.random.PRNGKey(0)
    k1, k2, k3, k4 = jax.random.split(key, 4)

    N, C, H, W = 2, 32, 8, 8

    # channels_first: NCHW, fused-layout kernel (no transposes, no pad)
    ln_cf = LayerNorm(C, eps=1e-6, data_format="channels_first")
    x_cf = jax.random.normal(k1, (N, C, H, W), dtype=jnp.float32)
    y_cf = jax.block_until_ready(ln_cf(x_cf))
    ref_cf = _ref_channels_first(x_cf, ln_cf.weight, ln_cf.bias, ln_cf.eps)
    assert y_cf.shape == (N, C, H, W)
    assert jnp.allclose(y_cf, ref_cf, atol=1e-5, rtol=1e-5)

    # channels_first with odd spatial extent (full-extent lane block)
    x_cf_odd = jax.random.normal(k4, (1, C, 5, 5), dtype=jnp.float32)
    y_cf_odd = jax.block_until_ready(ln_cf(x_cf_odd))
    ref_cf_odd = _ref_channels_first(x_cf_odd, ln_cf.weight, ln_cf.bias, ln_cf.eps)
    assert jnp.allclose(y_cf_odd, ref_cf_odd, atol=1e-5, rtol=1e-5)

    # channels_last: NHWC (lane-packed path, C=32 -> g=4, R=128)
    ln_cl = LayerNorm(C, eps=1e-6, data_format="channels_last")
    x_cl = jax.random.normal(k2, (N, H, W, C), dtype=jnp.float32)
    y_cl = jax.block_until_ready(ln_cl(x_cl))
    ref_cl = _ref_channels_last(x_cl, ln_cl.weight, ln_cl.bias, ln_cl.eps)
    assert y_cl.shape == (N, H, W, C)
    assert jnp.allclose(y_cl, ref_cl, atol=1e-5, rtol=1e-5)

    # channels_last with an "unfriendly" row count (R=105 -> direct fallback path)
    x_odd = jax.random.normal(k3, (3, 5, 7, C), dtype=jnp.float32)
    y_odd = jax.block_until_ready(ln_cl(x_odd))
    ref_odd = _ref_channels_last(x_odd, ln_cl.weight, ln_cl.bias, ln_cl.eps)
    assert y_odd.shape == (3, 5, 7, C)
    assert jnp.allclose(y_odd, ref_odd, atol=1e-5, rtol=1e-5)

    print("KERNEL_OK")
</pallas_src>

<mosaic_0001>
module attributes {stable_mosaic.version = 11 : i64} {
  func.func @_ln_first_kernel(%arg0: i32, %arg1: i32, %arg2: memref<1x32x64xf32, #tpu.memory_space<vmem>>, %arg3: memref<1x32x1xf32, #tpu.memory_space<vmem>>, %arg4: memref<1x32x1xf32, #tpu.memory_space<vmem>>, %arg5: memref<1x32x64xf32, #tpu.memory_space<vmem>>) attributes {dimension_semantics = [#tpu.dimension_semantics<parallel>, #tpu.dimension_semantics<parallel>], iteration_bounds = array<i64: 2, 1>, scalar_prefetch = 0 : i64, scratch_operands = 0 : i64, tpu.core_type = #tpu.core_type<tc>, window_params = [{transform_indices = @transform_0, window_bounds = array<i64: 1, 32, 64>}, {pipeline_mode = #tpu.pipeline_mode<synchronous>, transform_indices = @transform_1, window_bounds = array<i64: 1, 32, 1>}, {pipeline_mode = #tpu.pipeline_mode<synchronous>, transform_indices = @transform_2, window_bounds = array<i64: 1, 32, 1>}, {transform_indices = @transform_3, window_bounds = array<i64: 1, 32, 64>}]} {
    %c0 = arith.constant 0 : index
    %c0_0 = arith.constant 0 : index
    %c0_1 = arith.constant 0 : index
    %0 = vector.load %arg2[%c0, %c0_0, %c0_1] : memref<1x32x64xf32, #tpu.memory_space<vmem>>, vector<1x32x64xf32>
    %cst = arith.constant dense<0.000000e+00> : vector<1x64xf32>
    %1 = vector.multi_reduction <add>, %0, %cst [1] : vector<1x32x64xf32> to vector<1x64xf32>
    %2 = vector.shape_cast %1 : vector<1x64xf32> to vector<1x1x64xf32>
    %cst_2 = arith.constant 3.200000e+01 : f32
    %3 = vector.broadcast %cst_2 : f32 to vector<1x1x64xf32>
    %4 = arith.divf %2, %3 : vector<1x1x64xf32>
    %5 = vector.broadcast %4 : vector<1x1x64xf32> to vector<1x32x64xf32>
    %6 = arith.subf %0, %5 : vector<1x32x64xf32>
    %7 = arith.mulf %6, %6 : vector<1x32x64xf32>
    %cst_3 = arith.constant dense<0.000000e+00> : vector<1x64xf32>
    %8 = vector.multi_reduction <add>, %7, %cst_3 [1] : vector<1x32x64xf32> to vector<1x64xf32>
    %9 = vector.shape_cast %8 : vector<1x64xf32> to vector<1x1x64xf32>
    %cst_4 = arith.constant 3.200000e+01 : f32
    %10 = vector.broadcast %cst_4 : f32 to vector<1x1x64xf32>
    %11 = arith.divf %9, %10 : vector<1x1x64xf32>
    %cst_5 = arith.constant 9.99999997E-7 : f32
    %12 = vector.broadcast %cst_5 : f32 to vector<1x1x64xf32>
    %13 = arith.addf %11, %12 : vector<1x1x64xf32>
    %14 = math.rsqrt %13 : vector<1x1x64xf32>
    %c0_6 = arith.constant 0 : index
    %c0_7 = arith.constant 0 : index
    %c0_8 = arith.constant 0 : index
    %15 = vector.load %arg3[%c0_6, %c0_7, %c0_8] : memref<1x32x1xf32, #tpu.memory_space<vmem>>, vector<1x32x1xf32>
    %c0_9 = arith.constant 0 : index
    %c0_10 = arith.constant 0 : index
    %c0_11 = arith.constant 0 : index
    %16 = vector.load %arg4[%c0_9, %c0_10, %c0_11] : memref<1x32x1xf32, #tpu.memory_space<vmem>>, vector<1x32x1xf32>
    %17 = vector.broadcast %14 : vector<1x1x64xf32> to vector<1x32x64xf32>
    %18 = arith.mulf %6, %17 : vector<1x32x64xf32>
    %19 = vector.broadcast %15 : vector<1x32x1xf32> to vector<1x32x64xf32>
    %20 = arith.mulf %18, %19 : vector<1x32x64xf32>
    %21 = vector.broadcast %16 : vector<1x32x1xf32> to vector<1x32x64xf32>
    %22 = arith.addf %20, %21 : vector<1x32x64xf32>
    %c0_12 = arith.constant 0 : index
    %c0_13 = arith.constant 0 : index
    %c0_14 = arith.constant 0 : index
    %23 = vector.load %arg5[%c0_12, %c0_13, %c0_14] : memref<1x32x64xf32, #tpu.memory_space<vmem>>, vector<1x32x64xf32>
    tpu.vector_store %arg5[%c0_12, %c0_13, %c0_14], %22 {strides = array<i32>} : memref<1x32x64xf32, #tpu.memory_space<vmem>>, vector<1x32x64xf32>,
    return
  }
  func.func @transform_0(%arg0: i32, %arg1: i32) -> (i32, i32, i32) {
    %c0_i32 = arith.constant 0 : i32
    %c0_i32_0 = arith.constant 0 : i32
    return %arg0, %c0_i32, %arg1 : i32, i32, i32
  }
  func.func @transform_1(%arg0: i32, %arg1: i32) -> (i32, i32, i32) {
    %c0_i32 = arith.constant 0 : i32
    %c0_i32_0 = arith.constant 0 : i32
    %c0_i32_1 = arith.constant 0 : i32
    %c0_i32_2 = arith.constant 0 : i32
    return %c0_i32, %c0_i32_0, %c0_i32_1 : i32, i32, i32
  }
  func.func @transform_2(%arg0: i32, %arg1: i32) -> (i32, i32, i32) {
    %c0_i32 = arith.constant 0 : i32
    %c0_i32_0 = arith.constant 0 : i32
    %c0_i32_1 = arith.constant 0 : i32
    %c0_i32_2 = arith.constant 0 : i32
    return %c0_i32, %c0_i32_0, %c0_i32_1 : i32, i32, i32
  }
  func.func @transform_3(%arg0: i32, %arg1: i32) -> (i32, i32, i32) {
    %c0_i32 = arith.constant 0 : i32
    %c0_i32_0 = arith.constant 0 : i32
    return %arg0, %c0_i32, %arg1 : i32, i32, i32
  }
}

</mosaic_0001>

<bundles_post_ra>
// kernel: tpu_custom_call.1
= control target key start
LH: loop header
LB: loop body
LE: loop exit
PB: predicated region body
PF: predicated region fallthrough
CT: control target
= control target key end

     0   :  { %8 = vsyncpa [#allocation3], 0  ;;  %s727_s0 = inlined_call_operand.vmem [shape: f32[2,32,64], index: 0, kind: input, shape index: {}]   ;;  %s728_s1 = inlined_call_operand.vmem [shape: f32[1,32,1], index: 1, kind: input, shape index: {}]   ;;  %s729_s2 = inlined_call_operand.vmem [shape: f32[1,32,1], index: 2, kind: input, shape index: {}]   ;;  %s730_s3 = inlined_call_operand.hbm [shape: f32[2,32,64], index: 3, kind: output, shape index: {}]  }
   0x1   :  { %10 = vsyncpa [#allocation3 + $0x1], 0  ;;  %s576_s12 = smov 0   ;;  %s578_s13 = smov 0  }
   0x2   :  { %s580_s14 = smov 0   ;;  %s582_s15 = smov 0  }
   0x3   :  { %s584_s16 = smov 0   ;;  %s586_s17 = smov 0  }
   0x4 LB: > { %s395_s18 = sadd.s32 4294967295, %s550_s17   ;;  %s396_s19 = sadd.s32 4294967294, %s550_s17   ;;  %s550_s17 = sphi %s586_s17, %s16_s17   ;;  %s546_s16 = sphi %s584_s16, %s737_s16   ;;  %s542_s15 = sphi %s582_s15, %s736_s15   ;;  %s538_s14 = sphi %s580_s14, %s735_s14   ;;  %s534_s13 = sphi %s578_s13, %s734_s13   ;;  %s530_s12 = sphi %s576_s12, %s733_s12  }
   0x5   : > { %s28_s20 = sadd.s32 1, %s546_s16  ;;  %s107_s21 = sadd.s32 1, %s538_s14 }
   0x6   : > { %p30_p0 = scmp.ge.s32.totalorder %s28_s20, 2  ;;  %p117_p1 = scmp.ne.s32.totalorder %s538_s14, %s534_s13 }
   0x7   : > { %p118_p2 = scmp.eq.s32.totalorder %s395_s18, 1  ;;  %p123_p3 = scmp.ne.s32.totalorder %s534_s13, %s530_s12 }
   0x8   : > { %s739_s20 = smov (%p30_p0, %s28_s20), 0  ;;  %p124_p5 = scmp.eq.s32.totalorder %s396_s19, 1 }
   0x9   : > { %p616_p4 = por %p118_p2, %p117_p1  ;;  %s102_s23 = ssub.s32 %s546_s16, %s739_s20 }
   0xa   : > { %p399_p6 = scmp.ge.s32.totalorder %s550_s17, 1  ;;  %p105_p7 = scmp.eq.s32.totalorder %s102_s23, 0 }
   0xb   : > { %p623_p8 = por %p124_p5, %p123_p3  ;;  %p159_p9 = scmp.lt.s32.totalorder %s550_s17, 3 }
   0xc   : > { %s629_s25 = scalar_select %p105_p7, %s538_s14, %s107_s21  }
   0xd   : > { %p160_p10 = pnand %p399_p6, %p159_p9 }
   0xe   : > { %v240_v0 = vld [vmem:[%s728_s1 + $0x10] sm:$0xff] (!%p160_p10)  ;;  %v238_v1 = vld [vmem:[%s728_s1] sm:$0xff] (!%p160_p10)  ;;  %v552_v2 = vmov (!%p160_p10), 0   ;;  %v241_v3 = vld [vmem:[%s728_s1 + $0x18] sm:$0xff] (!%p160_p10)  ;;  %p186_p11 = scmp.lt.s32.totalorder (!%p160_p10), %s542_s15, 1  ;;  %vm198_vm0 = vcmask (!%p160_p10), 523264  }
   0xf   : > { %163 = sbr.rel (%p160_p10) target bundleno = 173 (0xad), region = 32  ;;  %469 = vset.pattern.permute.xlu1 (!%p160_p10), %v552_v2  ;;  %468 = vset.pattern.permute.xlu0 (!%p160_p10), %v552_v2  ;;  %v239_v4 = vld [vmem:[%s728_s1 + $0x8] sm:$0xff] (!%p160_p10)  ;;  %v242_v6 = vld [vmem:[%s729_s2] sm:$0xff] (!%p160_p10)  ;;  %v245_v7 = vld [vmem:[%s729_s2 + $0x18] sm:$0xff] (!%p160_p10)  ;;  %s183_s30 = sand.u32 (!%p160_p10), 1, %s534_s13  }
  0x10   : > { %262 = vperm.xlu1 (!%p160_p10), %469, %v240_v0   ;;  %252 = vperm.xlu0 (!%p160_p10), %468, %v238_v1   ;;  %v243_v5 = vld [vmem:[%s729_s2 + $0x8] sm:$0xff] (!%p160_p10)  ;;  %v244_v8 = vld [vmem:[%s729_s2 + $0x10] sm:$0xff] (!%p160_p10)  ;;  %s400_s4 = sshll.u32 (!%p160_p10), %s183_s30, 5  ;;  %s409_s7 = sshll.u32 (!%p160_p10), %s542_s15, 9 }
  0x11   : > { %s185_s5 = scalar_lea.vmem (!%p160_p10), [#allocation2], %s400_s4  ;;  %s677_s10 = scalar_lea.hbm (!%p160_p10), %s730_s3, %s409_s7 }
  0x12   : > { %s317_s6 = sshll.u32 (!%p160_p10), %s185_s5, 4  ;;  %s553_s18 = smov (!%p160_p10), [#allocation2]   ;;  %s672_s6 = int_to_ptr.vmem [resolvable:$true] %s317_s6 }
  0x13   : > { %s476_s19 = sshll.u32 (!%p160_p10), %s553_s18, 4  ;;  %s477_s19 = int_to_ptr.vmem [resolvable:$false] %s476_s19 }
  0x14   : > { %267 = vperm.xlu1 (!%p160_p10), %469, %v241_v3   ;;  %257 = vperm.xlu0 (!%p160_p10), %468, %v239_v4   ;;  %s478_s21 = scalar_lea.vmem (!%p160_p10), %s477_s19, 1024  ;;  %p479_p1 = scmp.lt.s32.totalorder (!%p160_p10), %s672_s6, %s477_s19 }
  0x16   : > { %s187_s11 = scalar_select %p186_p11, %s542_s15, 1 }
  0x17   : > { %s681_s15 = scalar_lea.sflag [#allocation3], %s183_s30 }
  0x18   : > { %281 = vperm.xlu1 %469, %v243_v5   ;;  %276 = vperm.xlu0 %468, %v242_v6   ;;  %s408_s26 = sshll.u32 %s187_s11, 5  ;;  %s472_s11 = scalar_lea.vmem %s672_s6, 512 }
  0x19   : > { %s193_s29 = scalar_lea.vmem %s727_s0, %s408_s26  ;;  %p473_p12 = scmp.ne.s32.totalorder %s672_s6, %s472_s11 }
  0x1a   : > { %v194_v9 = vld [vmem:[%s193_s29] sm:$0xff]  ;;  %v195_v10 = vld [vmem:[%s193_s29 + $0x8] sm:$0xff]  ;;  %v196_v13 = vld [vmem:[%s193_s29 + $0x10] sm:$0xff]  ;;  %p480_p2 = scmp.lt.s32.totalorder %s478_s21, %s472_s11 }
  0x1b   : > { %v199_v11 = vsel %vm198_vm0, %v194_v9, 0.0  ;;  %v200_v12 = vsel %vm198_vm0, %v195_v10, 0.0  ;;  %v202_v15 = vsel %vm198_vm0, %v196_v13, 0.0  ;;  %v197_v16 = vld [vmem:[%s193_s29 + $0x18] sm:$0xff]  ;;  %p474_p13 = pnand %p473_p12, %p616_p4 }
  0x1c   : > { %291 = vperm.xlu1 %469, %v245_v7   ;;  %286 = vperm.xlu0 %468, %v244_v8   ;;  %v201_v14 = vadd.f32 %v200_v12, %v199_v11  ;;  %v204_v18 = vsel %vm198_vm0, %v197_v16, 0.0  ;;  %p481_p3 = por %p480_p2, %p479_p1 }
  0x1d   : > { %p475_p0 = pneg %p474_p13 }
  0x1e   : > { %v203_v17 = vadd.f32 %v202_v15, %v201_v14 }
  0x1f   : > { %p482_p5 = pnand %p481_p3, %p475_p0 }
  0x20   : > { %v205_v19 = vadd.f32 %v204_v18, %v203_v17 }
  0x22   : > { %v206_v20 = vrot.slane %v205_v19, 4 }
  0x24   : > { %v207_v21 = vadd.f32 %v206_v20, %v205_v19 }
  0x26   : > { %v208_v22 = vrot.slane %v207_v21, 2 }
  0x28   : > { %v209_v23 = vadd.f32 %v208_v22, %v207_v21 }
  0x2a   : > { %v210_v24 = vrot.slane %v209_v23, 1 }
  0x2c   : > { %v211_v25 = vadd.f32 %v210_v24, %v209_v23 }
  0x2e   : > { %v213_v26 = vmul.f32 0.03125, %v211_v25 }
  0x30   : > { %v214_v27 = vsub.f32 %v194_v9, %v213_v26  ;;  %v215_v28 = vsub.f32 %v195_v10, %v213_v26  ;;  %v216_v29 = vsub.f32 %v196_v13, %v213_v26  ;;  %v217_v32 = vsub.f32 %v197_v16, %v213_v26 }
  0x32   : > { %v218_v30 = vmul.f32 %v214_v27, %v214_v27  ;;  %v219_v31 = vmul.f32 %v215_v28, %v215_v28  ;;  %v220_v33 = vmul.f32 %v216_v29, %v216_v29  ;;  %v221_v37 = vmul.f32 %v217_v32, %v217_v32 }
  0x34   : > { %v222_v34 = vsel %vm198_vm0, %v218_v30, 0.0  ;;  %v223_v35 = vsel %vm198_vm0, %v219_v31, 0.0  ;;  %v225_v38 = vsel %vm198_vm0, %v220_v33, 0.0  ;;  %v227_v40 = vsel %vm198_vm0, %v221_v37, 0.0 }
  0x35   : > { %v224_v36 = vadd.f32 %v223_v35, %v222_v34 }
  0x37   : > { %v226_v39 = vadd.f32 %v225_v38, %v224_v36 }
  0x39   : > { %v228_v41 = vadd.f32 %v227_v40, %v226_v39 }
  0x3b   : > { %v229_v42 = vrot.slane %v228_v41, 4 }
  0x3d   : > { %v230_v43 = vadd.f32 %v229_v42, %v228_v41 }
  0x3f   : > { %v231_v44 = vrot.slane %v230_v43, 2 }
  0x41   : > { %v232_v45 = vadd.f32 %v231_v44, %v230_v43 }
  0x43   : > { %v233_v46 = vrot.slane %v232_v45, 1 }
  0x45   : > { %v234_v47 = vadd.f32 %v233_v46, %v232_v45 }
  0x47   : > { %v235_v48 = vmul.f32 0.03125, %v234_v47 }
  0x49   : > { %v236_v49 = vadd.f32 1e-06, %v235_v48 }
  0x4b   : > { %470 = vrsqrt.f32 %v236_v49 }
  0x55   : > { %v471_v50 = vpop.eup %470 }
  0x56   : > { %v246_v53 = vmul.f32 %v471_v50, %v214_v27  ;;  %v247_v54 = vmul.f32 %v471_v50, %v215_v28  ;;  %v248_v57 = vmul.f32 %v471_v50, %v216_v29  ;;  %v249_v59 = vmul.f32 %v471_v50, %v217_v32 }
  0x8f   : > { %v263_v51 = vpop.permute.xlu1 %262  ;;  %v253_v52 = vpop.permute.xlu0 %252 }
  0x90   : > { %v270_v58 = vmul.f32 %v253_v52, %v246_v53  ;;  %v272_v1 = vmul.f32 %v263_v51, %v248_v57 }
  0x93   : > { %v268_v55 = vpop.permute.xlu1 %267  ;;  %v258_v56 = vpop.permute.xlu0 %257 }
  0x94   : > { %v271_v60 = vmul.f32 %v258_v56, %v247_v54  ;;  %v273_v2 = vmul.f32 %v268_v55, %v249_v59 }
  0x97   : > { %v282_v61 = vpop.permute.xlu1 %281  ;;  %v277_v62 = vpop.permute.xlu0 %276 }
  0x98   : > { %v295_v63 = vadd.f32 %v282_v61, %v271_v60  ;;  %v294_v0 = vadd.f32 %v277_v62, %v270_v58 }
  0x9a   : > { %299 = vst.msk [vmem:[%s185_s5 + $0x8] sm:$0xff] %vm198_vm0, %v295_v63  ;;  %298 = vst.msk [vmem:[%s185_s5] sm:$0xff] %vm198_vm0, %v294_v0 }
  0x9b   : > { %v292_v3 = vpop.permute.xlu1 %291  ;;  %v287_v4 = vpop.permute.xlu0 %286 }
  0x9c   : > { %v297_v5 = vadd.f32 %v292_v3, %v273_v2  ;;  %v296_v6 = vadd.f32 %v287_v4, %v272_v1 }
  0x9e   : > { %301 = vst.msk [vmem:[%s185_s5 + $0x18] sm:$0xff] %vm198_vm0, %v297_v5  ;;  %300 = vst.msk [vmem:[%s185_s5 + $0x10] sm:$0xff] %vm198_vm0, %v296_v6 }
  0x9f   : > { %485 = shalt.err (!%p482_p5)
}
  0xa0   : > { %s486_s23 = scalar_lea.hbm %s677_s10, 512  ;;  %s490_s28 = scalar_lea.hbm %s730_s3, 1024 }
  0xa1   : > { %p487_p6 = scmp.ne.s32.totalorder %s677_s10, %s486_s23  ;;  %p491_p10 = scmp.lt.u32.totalorder %s677_s10, %s730_s3 }
  0xa2   : > { %p492_p11 = scmp.lt.u32.totalorder %s490_s28, %s486_s23  ;;  %p494_p13 = scmp.lt.u32.totalorder %s486_s23, %s677_s10 }
  0xa3   : > { %p488_p7 = pnand %p487_p6, %p616_p4 }
  0xa4   : > { %p493_p12 = por %p492_p11, %p491_p10 }
  0xa5   : > { %p489_p9 = pneg %p488_p7 }
  0xa6   : > { %p495_p0 = por %p494_p13, %p493_p12 }
  0xa8   : > { %p496_p1 = pnand %p495_p0, %p489_p9 }
  0xaa   : > { %499 = shalt.err (!%p496_p1)
}
  0xab   : > { %s554_s4 = smov 128   ;;  %s555_s5 = smov 8  }
  0xac   : > { %410 = dma.vmem_to_hbm [thread:$0]  (%p616_p4), %s672_s6, 512, %s677_s10, %s681_s15, %s554_s4, %s554_s4, %s555_s5  }
  0xad PF: > { %p416_p2 = scmp.ge.s32.totalorder %s550_s17, 2  ;;  %s332_s7 = sand.u32 1, %s530_s12  }
  0xae   : > { %s333_s8 = scalar_lea.sflag [#allocation3], %s332_s7 }
  0xaf   : > { %p413_p3 = pnand %p416_p2, %p623_p8 }
  0xb1   : > { %525 = dma.done.wait (!%p413_p3), %s333_s8, 512  }
  0xb2   : > { %527 = vsyncadd (!%p413_p3), %s333_s8, 4294966784  ;;  %s16_s17 = sadd.s32 1, %s550_s17   ;;  %s733_s12 = smov %s534_s13 }
  0xb3   : > { %p13_p5 = scmp.ge.s32.totalorder %s16_s17, 4   ;;  %s734_s13 = smov %s538_s14 }
  0xb4   : > { %s735_s14 = smov %s629_s25  ;;  %s736_s15 = smov %s546_s16 }
  0xb5   : > { %s737_s16 = smov %s739_s20  ;;  %15 = sbr.rel (!%p13_p5) target bundleno = 4 (0x4), region = 67 }
  0xbc   :  { %338 = vsyncpa [#allocation3], 1 }
  0xbd   :  { %340 = vsyncpa [#allocation3 + $0x1], 1 }

</bundles_post_ra>
